<compile_context>
chip_gen: v7x
topology: tpu7x:2x2x1
jax: 0.10.0
libtpu: 0.0.40
codegen_flags: <defaults>
</compile_context>

<pallas_src>
import jax
import jax.numpy as jnp
from jax.experimental import pallas as pl
from jax.experimental.pallas import tpu as pltpu

LANE = 128


def _vmem_capacity_bytes():
    try:
        info = pltpu.get_tpu_info()
        for attr in ("vmem_capacity_bytes", "vmem_size_bytes", "vmem_bytes"):
            v = getattr(info, attr, None)
            if v:
                return int(v)
    except Exception:
        pass
    return 64 * 1024 * 1024  # conservative fallback (v7x per-TC VMEM)


_VMEM_CAP = _vmem_capacity_bytes()
_VMEM_LIMIT = int(_VMEM_CAP * 9 // 10)
# Fused single pass keeps input + output slabs resident (8 bytes/elem f32);
# allow ~75% of VMEM for them (~12M elems on v5e/v6e, ~6M on v7x).
SINGLE_PASS_MAX_ELEMS = (_VMEM_CAP * 3 // 4) // 8
# Streamed two-pass tile size: 8 MiB tiles on v7x (fast HBM, small VMEM),
# 4 MiB on v5e/v6e — large enough that DMA time dominates the ~0.35us/step
# grid overhead.
TARGET_BLOCK_ELEMS = (2 * 1024 * 1024) if _VMEM_CAP <= 64 * 1024 * 1024 else (1024 * 1024)


def _pick_lane_width(n):
    for w in (1024, 512, 256, 128):
        if n % w == 0:
            return w
    return None


def _maybe_buffered_spec(block_shape, index_map, n_buffers):
    """BlockSpec with deeper prefetch if this jax version supports it."""
    try:
        return pl.BlockSpec(block_shape, index_map,
                            pipeline_mode=pl.Buffered(n_buffers))
    except Exception:
        return pl.BlockSpec(block_shape, index_map)


# ----------------- single fused pass (whole slab resident in VMEM) -----------------

def _make_fused_kernel(rows, width):
    n_groups = rows // 8
    tail = rows % 8

    def kernel(x_ref, o_ref):
        # Sum of squares, accumulated in an (8, width) vreg-scale accumulator so
        # no full-slab temporaries are materialized in VMEM.
        acc = jnp.zeros((8, width), jnp.float32)
        if n_groups > 0:
            def ssq_body(g, a):
                xs = x_ref[pl.ds(pl.multiple_of(g * 8, 8), 8), :]
                return a + xs * xs
            acc = jax.lax.fori_loop(0, n_groups, ssq_body, acc, unroll=4)
        ssq = jnp.sum(acc)
        if tail:
            xt = x_ref[pl.ds(n_groups * 8, tail), :]
            ssq = ssq + jnp.sum(xt * xt)

        inv = jax.lax.rsqrt(ssq)

        # Scale + store in row-group chunks (bounded temporaries, full vst tiles).
        if n_groups > 0:
            def scale_body(g, carry):
                idx = pl.multiple_of(g * 8, 8)
                o_ref[pl.ds(idx, 8), :] = x_ref[pl.ds(idx, 8), :] * inv
                return carry
            jax.lax.fori_loop(0, n_groups, scale_body, 0, unroll=4)
        if tail:
            o_ref[pl.ds(n_groups * 8, tail), :] = (
                x_ref[pl.ds(n_groups * 8, tail), :] * inv)

    return kernel


def _single_pass(x2d):
    rows, width = x2d.shape
    return pl.pallas_call(
        _make_fused_kernel(rows, width),
        out_shape=jax.ShapeDtypeStruct((rows, width), jnp.float32),
        compiler_params=pltpu.CompilerParams(vmem_limit_bytes=_VMEM_LIMIT),
    )(x2d)


# ----------------- two streamed passes (large inputs) -----------------

def _make_partial_sumsq_kernel(block_rows, width, total_rows, need_mask):
    n_groups = block_rows // 8
    n_fold = width // LANE

    def fold(acc):
        # Fold the (8, width) partial sums down to (8, 128): whole-vreg VPU adds.
        out = acc[:, 0:LANE]
        for c in range(1, n_fold):
            out = out + acc[:, c * LANE:(c + 1) * LANE]
        return out

    def kernel(x_ref, out_ref):
        zero = jnp.zeros((8, width), jnp.float32)

        def unmasked_body(g, a):
            xs = x_ref[pl.ds(pl.multiple_of(g * 8, 8), 8), :]
            return a + xs * xs

        if not need_mask:
            acc = jax.lax.fori_loop(0, n_groups, unmasked_body, zero, unroll=4)
            out_ref[0] = fold(acc)
        else:
            i = pl.program_id(0)
            is_last = i == pl.num_programs(0) - 1

            @pl.when(jnp.logical_not(is_last))
            def _():
                acc = jax.lax.fori_loop(0, n_groups, unmasked_body, zero, unroll=4)
                out_ref[0] = fold(acc)

            @pl.when(is_last)
            def _():
                rows_left = total_rows - i * block_rows
                # Hoisted out of the loop (built once per boundary block only).
                rid = jax.lax.broadcasted_iota(jnp.int32, (8, width), 0)

                def masked_body(g, a):
                    xs = x_ref[pl.ds(pl.multiple_of(g * 8, 8), 8), :]
                    xs = jnp.where(rid + g * 8 < rows_left, xs, 0.0)
                    return a + xs * xs

                acc = jax.lax.fori_loop(0, n_groups, masked_body, zero, unroll=4)
                out_ref[0] = fold(acc)

    return kernel


def _make_scale_kernel(block_rows, width):
    n_groups = block_rows // 8

    def kernel(inv_ref, x_ref, o_ref):
        inv = inv_ref[0]

        def body(g, carry):
            idx = pl.multiple_of(g * 8, 8)
            o_ref[pl.ds(idx, 8), :] = x_ref[pl.ds(idx, 8), :] * inv
            return carry

        jax.lax.fori_loop(0, n_groups, body, 0, unroll=4)

    return kernel


def _two_pass(x2d, block_elems=None):
    rows, width = x2d.shape
    if block_elems is None:
        block_elems = TARGET_BLOCK_ELEMS
    block_rows = max(8, (min(rows, block_elems // width) // 8) * 8)
    n_blocks = pl.cdiv(rows, block_rows)
    need_mask = (rows % block_rows) != 0

    # Pass 1: per-block (8, 128) vector partial sums (fully parallel grid,
    # deeper prefetch since it is a pure streaming read).
    partials = pl.pallas_call(
        _make_partial_sumsq_kernel(block_rows, width, rows, need_mask),
        out_shape=jax.ShapeDtypeStruct((n_blocks, 8, LANE), jnp.float32),
        grid=(n_blocks,),
        in_specs=[_maybe_buffered_spec((block_rows, width), lambda i: (i, 0), 3)],
        out_specs=pl.BlockSpec((1, 8, LANE), lambda i: (i, 0, 0)),
        compiler_params=pltpu.CompilerParams(
            dimension_semantics=("parallel",), vmem_limit_bytes=_VMEM_LIMIT),
    )(x2d)

    # Tiny cross-block reduce + rsqrt.
    inv = jax.lax.rsqrt(jnp.sum(partials)).reshape(1)

    # Pass 2: parallel elementwise scale, lane-dense output tiles.
    out2d = pl.pallas_call(
        _make_scale_kernel(block_rows, width),
        out_shape=jax.ShapeDtypeStruct((rows, width), jnp.float32),
        grid=(n_blocks,),
        in_specs=[
            pl.BlockSpec(memory_space=pltpu.MemorySpace.SMEM),
            pl.BlockSpec((block_rows, width), lambda i: (i, 0)),
        ],
        out_specs=pl.BlockSpec((block_rows, width), lambda i: (i, 0)),
        compiler_params=pltpu.CompilerParams(
            dimension_semantics=("parallel",), vmem_limit_bytes=_VMEM_LIMIT),
    )(inv, x2d)

    return out2d


# ----------------- wrapper -----------------

def _frobenius_norm_normalize(x):
    """Returns x / ||x||_F (Frobenius norm over all elements), same shape/dtype."""
    orig_shape = x.shape
    orig_dtype = x.dtype
    flat = x.reshape(-1)
    if flat.dtype != jnp.float32:
        # TODO(synk): handle bf16/f16 natively in-kernel (load low precision,
        # accumulate in f32) instead of materializing an f32 copy in HBM.
        flat = flat.astype(jnp.float32)
    n = flat.shape[0]

    width = _pick_lane_width(n)
    padded = False
    if width is None:
        # Rare fallback: element count not a multiple of 128.  Zero padding has
        # no effect on the sum of squares.
        width = LANE
        n_pad = pl.cdiv(n, LANE) * LANE
        flat = jnp.pad(flat, (0, n_pad - n))
        padded = True
    else:
        n_pad = n

    x2d = flat.reshape(n_pad // width, width)

    if n_pad <= SINGLE_PASS_MAX_ELEMS:
        out2d = _single_pass(x2d)
    else:
        out2d = _two_pass(x2d)

    out = out2d.reshape(-1)
    if padded:
        out = out[:n]
    return out.reshape(orig_shape).astype(orig_dtype)


frobenius_norm_normalize = jax.jit(_frobenius_norm_normalize)


if __name__ == "__main__":
    key = jax.random.PRNGKey(0)
    k1, k2, k3 = jax.random.split(key, 3)

    # Small NCHW input matching the PyTorch module's forward.
    x = jax.random.normal(k1, (2, 4, 16, 16), dtype=jnp.float32)
    out = jax.block_until_ready(frobenius_norm_normalize(x))
    ref = x / jnp.sqrt(jnp.sum(x * x))
    assert out.shape == x.shape and out.dtype == x.dtype
    assert jnp.allclose(out, ref, atol=2e-6, rtol=1e-5), "mismatch (fused path)"

    # Exercise the streamed two-pass path (multi-block grid + masked boundary
    # block + lane folding) with a small block override so the test stays tiny.
    y = jax.random.normal(k2, (520, 512), dtype=jnp.float32)
    out2 = jax.block_until_ready(_two_pass(y, block_elems=64 * 512))
    ref2 = y / jnp.sqrt(jnp.sum(y * y))
    assert jnp.allclose(out2, ref2, atol=2e-6, rtol=1e-5), "mismatch (two-pass path)"

    # Exercise the ragged (pad fallback) path.
    z = jax.random.normal(k3, (3, 5, 7), dtype=jnp.float32)
    out3 = jax.block_until_ready(frobenius_norm_normalize(z))
    ref3 = z / jnp.sqrt(jnp.sum(z * z))
    assert jnp.allclose(out3, ref3, atol=2e-6, rtol=1e-5), "mismatch (ragged path)"

    print("KERNEL_OK")
</pallas_src>

<mosaic_0001>
module attributes {stable_mosaic.version = 11 : i64} {
  func.func @kernel(%arg0: memref<2x1024xf32, #tpu.memory_space<vmem>>, %arg1: memref<2x1024xf32, #tpu.memory_space<vmem>>) attributes {dimension_semantics = [], scalar_prefetch = 0 : i64, scratch_operands = 0 : i64, tpu.core_type = #tpu.core_type<tc>} {
    %cst = arith.constant 0.000000e+00 : f32
    %0 = vector.broadcast %cst : f32 to vector<8x1024xf32>
    %1 = vector.shape_cast %0 : vector<8x1024xf32> to vector<1x8x1024xf32>
    %cst_0 = arith.constant dense<0.000000e+00> : vector<1xf32>
    %2 = vector.multi_reduction <add>, %1, %cst_0 [1, 2] : vector<1x8x1024xf32> to vector<1xf32>
    %3 = vector.shape_cast %2 : vector<1xf32> to vector<1x1x1xf32>
    %4 = vector.extract %3[0, 0, 0] : f32 from vector<1x1x1xf32>
    %c0 = arith.constant 0 : index
    %c0_1 = arith.constant 0 : index
    %5 = vector.load %arg0[%c0, %c0_1] : memref<2x1024xf32, #tpu.memory_space<vmem>>, vector<2x1024xf32>
    %6 = arith.mulf %5, %5 : vector<2x1024xf32>
    %7 = vector.shape_cast %6 : vector<2x1024xf32> to vector<1x2x1024xf32>
    %cst_2 = arith.constant dense<0.000000e+00> : vector<1xf32>
    %8 = vector.multi_reduction <add>, %7, %cst_2 [1, 2] : vector<1x2x1024xf32> to vector<1xf32>
    %9 = vector.shape_cast %8 : vector<1xf32> to vector<1x1x1xf32>
    %10 = vector.extract %9[0, 0, 0] : f32 from vector<1x1x1xf32>
    %11 = arith.addf %4, %10 : f32
    %12 = math.rsqrt %11 : f32
    %c0_3 = arith.constant 0 : index
    %c0_4 = arith.constant 0 : index
    %13 = vector.load %arg0[%c0_3, %c0_4] : memref<2x1024xf32, #tpu.memory_space<vmem>>, vector<2x1024xf32>
    %14 = vector.broadcast %12 : f32 to vector<2x1024xf32>
    %15 = arith.mulf %13, %14 : vector<2x1024xf32>
    %c0_5 = arith.constant 0 : index
    %c0_6 = arith.constant 0 : index
    %16 = vector.load %arg1[%c0_5, %c0_6] : memref<2x1024xf32, #tpu.memory_space<vmem>>, vector<2x1024xf32>
    tpu.vector_store %arg1[%c0_5, %c0_6], %15 {strides = array<i32>} : memref<2x1024xf32, #tpu.memory_space<vmem>>, vector<2x1024xf32>,
    return
  }
}

</mosaic_0001>

<bundles_post_ra>
// kernel: _frobenius_norm_normalize.1
= control target key start
LH: loop header
LB: loop body
LE: loop exit
PB: predicated region body
PF: predicated region fallthrough
CT: control target
= control target key end

     0   :  { %v27_v0 = vlaneseq  ;;  %v113_v1 = vmov 0.0   ;;  %v114_v3 = vmov 1983009808   ;;  %vm65_vm0 = vcmask 1041408   ;;  %s145_s0 = inlined_call_operand.vmem [shape: f32[2,1024], index: 0, kind: input, shape index: {}]   ;;  %s146_s1 = inlined_call_operand.vmem [shape: f32[2,1024], index: 1, kind: output, shape index: {}]  }
   0x1   :  { %8 = vadd.xlane.f32.xlu0 %v113_v1  ;;  %v17_v2 = vld [vmem:[%s145_s0] sm:$0xff]  ;;  %v25_v4 = vunpack.c.l.s4 %v114_v3  ;;  %v18_v5 = vld [vmem:[%s145_s0 + $0x8] sm:$0xff] }
   0x2   :  { %v19_v6 = vmul.f32 %v17_v2, %v17_v2  ;;  %v28_v7 = vshrl.u32 %v27_v0, 7  ;;  %v20_v10 = vmul.f32 %v18_v5, %v18_v5 }
   0x3   :  { %v26_v8 = vunpack.c.0.s8 %v25_v4 }
   0x4   :  { %v23_v9 = vcombine.high %v19_v6, %v19_v6  ;;  %v40_v16 = vcombine.high %v20_v10, %v20_v10 }
   0x5   :  { %v29_v11 = vsub.s32 %v26_v8, %v28_v7 }
   0x7   :  { %v30_v12 = vrot.slane %v19_v6, %v29_v11  ;;  %v37_v13 = vrot.slane %v23_v9, %v29_v11  ;;  %v47_v17 = vrot.slane %v20_v10, %v29_v11  ;;  %v54_v22 = vrot.slane %v40_v16, %v29_v11 }
   0x9   :  { %v38_v14 = vcombine.high %v30_v12, %v30_v12  ;;  %v39_v15 = vcombine.high %v37_v13, %v37_v13  ;;  %v66_v18 = vsel %vm65_vm0, %v30_v12, 0.0  ;;  %v69_v20 = vsel %vm65_vm0, %v37_v13, 0.0 }
   0xa   :  { %v55_v23 = vcombine.high %v47_v17, %v47_v17  ;;  %v73_v26 = vsel %vm65_vm0, %v47_v17, 0.0  ;;  %v56_v28 = vcombine.high %v54_v22, %v54_v22  ;;  %v77_v31 = vsel %vm65_vm0, %v54_v22, 0.0 }
   0xb   :  { %v67_v19 = vsel %vm65_vm0, %v38_v14, 0.0  ;;  %v71_v24 = vsel %vm65_vm0, %v39_v15, 0.0 }
   0xc   :  { %v68_v21 = vadd.f32 %v67_v19, %v66_v18  ;;  %v75_v29 = vsel %vm65_vm0, %v55_v23, 0.0  ;;  %v79_v33 = vsel %vm65_vm0, %v56_v28, 0.0 }
   0xe   :  { %v70_v25 = vadd.f32 %v69_v20, %v68_v21 }
  0x10   :  { %v72_v27 = vadd.f32 %v71_v24, %v70_v25 }
  0x12   :  { %v74_v30 = vadd.f32 %v73_v26, %v72_v27 }
  0x14   :  { %v76_v32 = vadd.f32 %v75_v29, %v74_v30 }
  0x16   :  { %v78_v34 = vadd.f32 %v77_v31, %v76_v32 }
  0x18   :  { %v80_v35 = vadd.f32 %v79_v33, %v78_v34 }
  0x1a   :  { %81 = vadd.xlane.f32.xlu0 %v80_v35 }
  0x8e   :  { %v9_v36 = vpop.xlane.xlu0 %8 }
  0x8f   :  { %v10_v37 = vrot.slane %v9_v36, 4 }
  0x91   :  { %v11_v38 = vadd.f32 %v10_v37, %v9_v36 }
  0x93   :  { %v12_v39 = vrot.slane %v11_v38, 2 }
  0x95   :  { %v13_v40 = vadd.f32 %v12_v39, %v11_v38 }
  0x97   :  { %v14_v41 = vrot.slane %v13_v40, 1 }
  0x99   :  { %v15_v42 = vadd.f32 %v14_v41, %v13_v40 }
  0x9b   :  { %103 = vpush %v15_v42 }
  0xa7   :  { %v82_v43 = vpop.xlane.xlu0 %81 }
  0xa8   :  { %v83_v44 = vrot.slane %v82_v43, 4 }
  0xaa   :  { %v84_v45 = vadd.f32 %v83_v44, %v82_v43 }
  0xac   :  { %v85_v46 = vrot.slane %v84_v45, 2 }
  0xae   :  { %v86_v47 = vadd.f32 %v85_v46, %v84_v45 }
  0xb0   :  { %v87_v48 = vrot.slane %v86_v47, 1 }
  0xb2   :  { %v88_v49 = vadd.f32 %v87_v48, %v86_v47 }
  0xb4   :  { %105 = vpush %v88_v49 }
  0xcc   :  { %s104_s0 = spop %103 }
  0xe5   :  { %s106_s10 = spop %105 }
  0xe6   :  { %s90_s11 = sadd.f32 %s106_s10, %s104_s0 }
  0xe8   :  { %v91_v50 = vstv %s90_s11 }
  0xe9   :  { %111 = vrsqrt.f32 %v91_v50 }
  0xf3   :  { %v112_v51 = vpop.eup %111 }
  0xf4   :  { %107 = vpush %v112_v51 }
 0x125   :  { %s108_s12 = spop %107 }
 0x126   :  { %v94_v52 = vstv %s108_s12 }
 0x127   :  { %v95_v53 = vmul.f32 %v94_v52, %v17_v2  ;;  %v96_v54 = vmul.f32 %v94_v52, %v18_v5 }
 0x129   :  { %97 = vst [vmem:[%s146_s1] sm:$0xff] %v95_v53  ;;  %98 = vst [vmem:[%s146_s1 + $0x8] sm:$0xff] %v96_v54 }

</bundles_post_ra>
